<compile_context>
chip_gen: v6e
topology: v6e:2x2x1
jax: 0.10.0
libtpu: 0.0.40
codegen_flags: <defaults>
</compile_context>

<pallas_src>
import functools

import jax
import jax.numpy as jnp
from jax.experimental import pallas as pl
from jax.experimental.pallas import tpu as pltpu


def _bf16_dot(a, b):
    """MXU matmul with bf16 operands and f32 accumulation."""
    return jnp.dot(a.astype(jnp.bfloat16), b.astype(jnp.bfloat16),
                   preferred_element_type=jnp.float32)


def gcn_modified_kernel(feat_ref, adj_ref, drop_ref, w1_ref, b1_ref, w2_ref,
                        b2_ref, out_ref, *, l1_conv, l2_conv):
    """Fused forward pass for one batch element (grid axis 0 = batch)."""
    A = adj_ref[0]          # (N, N) f32
    x = feat_ref[0]         # (N, Fin) f32

    # add_loop diagonal mask, built once and reused by both layers.
    rows = jax.lax.broadcasted_iota(jnp.int32, A.shape, 0)
    cols = jax.lax.broadcasted_iota(jnp.int32, A.shape, 1)
    is_diag = rows == cols

    def mat_power(p):
        """A**p via square-and-multiply (static exponent). None means identity (p == 0)."""
        if p == 0:
            return None
        result = None
        base = A
        e = p
        while e:
            if e & 1:
                result = base if result is None else _bf16_dot(result, base)
            e >>= 1
            if e:
                base = _bf16_dot(base, base)
        return result

    # Reuse the lower power between the two layers: A**hi = A**lo @ A**(hi - lo).
    p_lo, p_hi = min(l1_conv, l2_conv), max(l1_conv, l2_conv)
    A_lo = mat_power(p_lo)
    if p_hi == p_lo:
        A_hi = A_lo
    else:
        A_diff = mat_power(p_hi - p_lo)
        A_hi = A_diff if A_lo is None else _bf16_dot(A_lo, A_diff)
    A1p, A2p = (A_lo, A_hi) if l1_conv <= l2_conv else (A_hi, A_lo)

    def propagate(Ap, h):
        """(D^-1/2 (A**p with diag := 1) D^-1/2) @ h, normalization folded into h."""
        if Ap is None:                      # A**0 = I: diag already 1, deg == 1
            return h
        Ad = jnp.where(is_diag, 1.0, Ap)                              # add_loop: diag = 1
        deg = jnp.maximum(jnp.sum(Ad, axis=-1, keepdims=True), 1.0)   # clamp(min=1), f32
        dinv = jax.lax.rsqrt(deg)                                     # (N, 1) f32
        # D^-1/2 Ad D^-1/2 @ h  ==  dinv * (Ad @ (dinv * h))
        return dinv * _bf16_dot(Ad, dinv * h)

    # ---- layer 1: relu(DenseGCNConv(feat, adj**l1_conv)) ----
    h = jnp.dot(x, w1_ref[...], preferred_element_type=jnp.float32)   # X @ W1
    h = propagate(A1p, h) + b1_ref[...]
    h = jnp.maximum(h, 0.0)

    # ---- dropout(p=0.5, training=True): binary keep mask; 2x scale folded into W2 ----
    h = h * drop_ref[0]

    # ---- layer 2: sigmoid(DenseGCNConv(h, adj**l2_conv)) ----
    y = jnp.dot(h, w2_ref[...], preferred_element_type=jnp.float32)   # H @ (scale*W2), lane padded
    y = propagate(A2p, y) + b2_ref[...]
    out_ref[0] = jax.nn.sigmoid(y).astype(out_ref.dtype)


def gcn_modified_forward(feat, adj, w1, b1, w2, b2, *, l1_conv, l2_conv,
                         dropout_rng=None, training=True):
    B, N, Fin = feat.shape
    H = w1.shape[1]
    Fout = w2.shape[1]
    assert adj.shape == (B, N, N)

    # Dropout keep mask generated host-side (Bernoulli(0.5) keep). The 1/(1-p)=2 scale
    # is folded into W2 below, so the kernel multiplies by a {0,1} mask only.
    if training:
        if dropout_rng is None:
            dropout_rng = jax.random.PRNGKey(0)
        keep = jax.random.bernoulli(dropout_rng, 0.5, (B, N, H)).astype(jnp.float32)
        w2_scale = 2.0
    else:
        keep = jnp.ones((B, N, H), jnp.float32)
        w2_scale = 1.0

    # Lane-dense output path: pad output features up to a multiple of 128 with zero
    # columns in W2/b2 (unmasked vector stores), slice back after the kernel.
    LANE = 128
    Fp = ((Fout + LANE - 1) // LANE) * LANE
    w2p = jnp.zeros((H, Fp), jnp.float32).at[:, :Fout].set(
        w2.astype(jnp.float32) * w2_scale)
    b2p = jnp.zeros((1, Fp), jnp.float32).at[:, :Fout].set(b2.astype(jnp.float32))

    kernel = functools.partial(gcn_modified_kernel, l1_conv=l1_conv, l2_conv=l2_conv)

    grid_spec = pltpu.PrefetchScalarGridSpec(
        num_scalar_prefetch=0,
        grid=(B,),
        in_specs=[
            pl.BlockSpec((1, N, Fin), lambda b: (b, 0, 0)),   # feat
            pl.BlockSpec((1, N, N),   lambda b: (b, 0, 0)),   # adj
            pl.BlockSpec((1, N, H),   lambda b: (b, 0, 0)),   # dropout keep mask
            pl.BlockSpec((Fin, H),    lambda b: (0, 0)),      # W1
            pl.BlockSpec((1, H),      lambda b: (0, 0)),      # b1
            pl.BlockSpec((H, Fp),     lambda b: (0, 0)),      # W2 (lane padded, 2x folded)
            pl.BlockSpec((1, Fp),     lambda b: (0, 0)),      # b2 (lane padded)
        ],
        out_specs=pl.BlockSpec((1, N, Fp), lambda b: (b, 0, 0)),
    )

    # Explicit scoped-VMEM budget: double-buffered blocks + in-kernel N^2 intermediates.
    fbytes = 4
    est = fbytes * (2 * N * N                       # adj double buffer
                    + 2 * N * (Fin + H + Fp)        # feat / dropout / out double buffers
                    + 5 * N * N                     # A-power + diag-set intermediates
                    + 4 * N * max(H, Fp))           # feature-path intermediates
    vmem_limit = int(min(100 * 2**20, max(32 * 2**20, 2 * est)))
    # TODO(synk): for N large enough that the N x N adj block approaches v7x's 64 MiB VMEM,
    # stream row-tiles of A**p via memory_space=pl.ANY + pltpu.emit_pipeline instead.

    out_padded = pl.pallas_call(
        kernel,
        out_shape=jax.ShapeDtypeStruct((B, N, Fp), jnp.float32),
        grid_spec=grid_spec,
        compiler_params=pltpu.CompilerParams(
            dimension_semantics=("parallel",),      # batch elements are independent
            vmem_limit_bytes=vmem_limit,
        ),
    )(feat, adj, keep, w1, b1, w2p, b2p)

    return out_padded[:, :, :Fout]


def glorot(key, fan_in, fan_out):
    limit = jnp.sqrt(6.0 / (fan_in + fan_out))
    return jax.random.uniform(key, (fan_in, fan_out), jnp.float32, -limit, limit)


if __name__ == "__main__":
    # small, deterministic example: batch=2, nodes=8, in=4, hid=32, out=4
    B, N, IN_FEAT, HID_FEAT, OUT_FEAT = 2, 8, 4, 32, 4
    L1_CONV, L2_CONV = 1, 2

    key = jax.random.PRNGKey(0)
    k_feat, k_adj, k_w1, k_w2, k_drop = jax.random.split(key, 5)

    feat = jax.random.normal(k_feat, (B, N, IN_FEAT), jnp.float32)

    # symmetric 0/1 adjacency, zero diagonal (add_loop sets diag inside the conv)
    raw = jax.random.uniform(k_adj, (B, N, N))
    adj = (raw > 0.6).astype(jnp.float32)
    adj = jnp.maximum(adj, jnp.swapaxes(adj, -1, -2))
    adj = adj * (1.0 - jnp.eye(N, dtype=jnp.float32))

    # DenseGCNConv params: glorot weights (lin has no bias), zero output bias
    w1 = glorot(k_w1, IN_FEAT, HID_FEAT)
    b1 = jnp.zeros((1, HID_FEAT), jnp.float32)
    w2 = glorot(k_w2, HID_FEAT, OUT_FEAT)
    b2 = jnp.zeros((1, OUT_FEAT), jnp.float32)

    out = gcn_modified_forward(feat, adj, w1, b1, w2, b2,
                               l1_conv=L1_CONV, l2_conv=L2_CONV,
                               dropout_rng=k_drop, training=True)
    jax.block_until_ready(out)

    assert out.shape == (B, N, OUT_FEAT)
    assert bool(jnp.all((out >= 0.0) & (out <= 1.0)))  # sigmoid range sanity check
    print("KERNEL_OK")
</pallas_src>

<mosaic_0001>
module attributes {stable_mosaic.version = 11 : i64} {
  func.func @gcn_modified_kernel(%arg0: i32, %arg1: memref<1x8x4xf32, #tpu.memory_space<vmem>>, %arg2: memref<1x8x8xf32, #tpu.memory_space<vmem>>, %arg3: memref<1x8x32xf32, #tpu.memory_space<vmem>>, %arg4: memref<4x32xf32, #tpu.memory_space<vmem>>, %arg5: memref<1x32xf32, #tpu.memory_space<vmem>>, %arg6: memref<32x128xf32, #tpu.memory_space<vmem>>, %arg7: memref<1x128xf32, #tpu.memory_space<vmem>>, %arg8: memref<1x8x128xf32, #tpu.memory_space<vmem>>) attributes {dimension_semantics = [#tpu.dimension_semantics<parallel>], iteration_bounds = array<i64: 2>, scalar_prefetch = 0 : i64, scratch_operands = 0 : i64, tpu.core_type = #tpu.core_type<tc>, window_params = [{transform_indices = @transform_0, window_bounds = array<i64: 1, 8, 4>}, {transform_indices = @transform_1, window_bounds = array<i64: 1, 8, 8>}, {transform_indices = @transform_2, window_bounds = array<i64: 1, 8, 32>}, {pipeline_mode = #tpu.pipeline_mode<synchronous>, transform_indices = @transform_3, window_bounds = array<i64: 4, 32>}, {pipeline_mode = #tpu.pipeline_mode<synchronous>, transform_indices = @transform_4, window_bounds = array<i64: 1, 32>}, {pipeline_mode = #tpu.pipeline_mode<synchronous>, transform_indices = @transform_5, window_bounds = array<i64: 32, 128>}, {pipeline_mode = #tpu.pipeline_mode<synchronous>, transform_indices = @transform_6, window_bounds = array<i64: 1, 128>}, {transform_indices = @transform_7, window_bounds = array<i64: 1, 8, 128>}]} {
    %c0 = arith.constant 0 : index
    %c0_0 = arith.constant 0 : index
    %c0_1 = arith.constant 0 : index
    %0 = vector.load %arg2[%c0, %c0_0, %c0_1] : memref<1x8x8xf32, #tpu.memory_space<vmem>>, vector<1x8x8xf32>
    %1 = vector.shape_cast %0 : vector<1x8x8xf32> to vector<8x8xf32>
    %c0_2 = arith.constant 0 : index
    %c0_3 = arith.constant 0 : index
    %c0_4 = arith.constant 0 : index
    %2 = vector.load %arg1[%c0_2, %c0_3, %c0_4] : memref<1x8x4xf32, #tpu.memory_space<vmem>>, vector<1x8x4xf32>
    %3 = vector.shape_cast %2 : vector<1x8x4xf32> to vector<8x4xf32>
    %4 = tpu.iota {dimensions = array<i32: 0>} : vector<8x8xi32>
    %5 = tpu.iota {dimensions = array<i32: 1>} : vector<8x8xi32>
    %6 = arith.cmpi eq, %4, %5 : vector<8x8xi32>
    %7 = arith.truncf %1 : vector<8x8xf32> to vector<8x8xbf16>
    %8 = arith.truncf %1 : vector<8x8xf32> to vector<8x8xbf16>
    %cst = arith.constant dense<0.000000e+00> : vector<8x8xf32>
    %9 = tpu.matmul %7, %8, %cst {dimension_numbers = #tpu.dot_dimension_numbers<[1], [0], [0], [1], [0, 0, 1, 1], [], []>} : vector<8x8xbf16>, vector<8x8xbf16>, vector<8x8xf32> -> vector<8x8xf32>
    %c0_5 = arith.constant 0 : index
    %c0_6 = arith.constant 0 : index
    %10 = vector.load %arg4[%c0_5, %c0_6] : memref<4x32xf32, #tpu.memory_space<vmem>>, vector<4x32xf32>
    %cst_7 = arith.constant dense<0.000000e+00> : vector<8x32xf32>
    %11 = tpu.matmul %3, %10, %cst_7 {dimension_numbers = #tpu.dot_dimension_numbers<[1], [0], [0], [1], [0, 0, 1, 1], [], []>} : vector<8x4xf32>, vector<4x32xf32>, vector<8x32xf32> -> vector<8x32xf32>
    %cst_8 = arith.constant 1.000000e+00 : f32
    %12 = vector.broadcast %cst_8 : f32 to vector<8x8xf32>
    %13 = arith.select %6, %12, %1 : vector<8x8xi1>, vector<8x8xf32>
    %cst_9 = arith.constant dense<0.000000e+00> : vector<8xf32>
    %14 = vector.multi_reduction <add>, %13, %cst_9 [1] : vector<8x8xf32> to vector<8xf32>
    %15 = vector.shape_cast %14 : vector<8xf32> to vector<8x1xf32>
    %cst_10 = arith.constant 1.000000e+00 : f32
    %16 = vector.broadcast %cst_10 : f32 to vector<8x1xf32>
    %17 = arith.maximumf %15, %16 : vector<8x1xf32>
    %18 = math.rsqrt %17 : vector<8x1xf32>
    %19 = vector.broadcast %18 : vector<8x1xf32> to vector<8x32xf32>
    %20 = arith.mulf %19, %11 : vector<8x32xf32>
    %21 = arith.truncf %13 : vector<8x8xf32> to vector<8x8xbf16>
    %22 = arith.truncf %20 : vector<8x32xf32> to vector<8x32xbf16>
    %cst_11 = arith.constant dense<0.000000e+00> : vector<8x32xf32>
    %23 = tpu.matmul %21, %22, %cst_11 {dimension_numbers = #tpu.dot_dimension_numbers<[1], [0], [0], [1], [0, 0, 1, 1], [], []>} : vector<8x8xbf16>, vector<8x32xbf16>, vector<8x32xf32> -> vector<8x32xf32>
    %24 = vector.broadcast %18 : vector<8x1xf32> to vector<8x32xf32>
    %25 = arith.mulf %24, %23 : vector<8x32xf32>
    %c0_12 = arith.constant 0 : index
    %c0_13 = arith.constant 0 : index
    %26 = vector.load %arg5[%c0_12, %c0_13] : memref<1x32xf32, #tpu.memory_space<vmem>>, vector<1x32xf32>
    %27 = vector.broadcast %26 : vector<1x32xf32> to vector<8x32xf32>
    %28 = arith.addf %25, %27 : vector<8x32xf32>
    %cst_14 = arith.constant 0.000000e+00 : f32
    %29 = vector.broadcast %cst_14 : f32 to vector<8x32xf32>
    %30 = arith.maximumf %28, %29 : vector<8x32xf32>
    %c0_15 = arith.constant 0 : index
    %c0_16 = arith.constant 0 : index
    %c0_17 = arith.constant 0 : index
    %31 = vector.load %arg3[%c0_15, %c0_16, %c0_17] : memref<1x8x32xf32, #tpu.memory_space<vmem>>, vector<1x8x32xf32>
    %32 = vector.shape_cast %31 : vector<1x8x32xf32> to vector<8x32xf32>
    %33 = arith.mulf %30, %32 : vector<8x32xf32>
    %c0_18 = arith.constant 0 : index
    %c0_19 = arith.constant 0 : index
    %34 = vector.load %arg6[%c0_18, %c0_19] : memref<32x128xf32, #tpu.memory_space<vmem>>, vector<32x128xf32>
    %cst_20 = arith.constant dense<0.000000e+00> : vector<8x128xf32>
    %35 = tpu.matmul %33, %34, %cst_20 {dimension_numbers = #tpu.dot_dimension_numbers<[1], [0], [0], [1], [0, 0, 1, 1], [], []>} : vector<8x32xf32>, vector<32x128xf32>, vector<8x128xf32> -> vector<8x128xf32>
    %cst_21 = arith.constant 1.000000e+00 : f32
    %36 = vector.broadcast %cst_21 : f32 to vector<8x8xf32>
    %37 = arith.select %6, %36, %9 : vector<8x8xi1>, vector<8x8xf32>
    %cst_22 = arith.constant dense<0.000000e+00> : vector<8xf32>
    %38 = vector.multi_reduction <add>, %37, %cst_22 [1] : vector<8x8xf32> to vector<8xf32>
    %39 = vector.shape_cast %38 : vector<8xf32> to vector<8x1xf32>
    %cst_23 = arith.constant 1.000000e+00 : f32
    %40 = vector.broadcast %cst_23 : f32 to vector<8x1xf32>
    %41 = arith.maximumf %39, %40 : vector<8x1xf32>
    %42 = math.rsqrt %41 : vector<8x1xf32>
    %43 = vector.broadcast %42 : vector<8x1xf32> to vector<8x128xf32>
    %44 = arith.mulf %43, %35 : vector<8x128xf32>
    %45 = arith.truncf %37 : vector<8x8xf32> to vector<8x8xbf16>
    %46 = arith.truncf %44 : vector<8x128xf32> to vector<8x128xbf16>
    %cst_24 = arith.constant dense<0.000000e+00> : vector<8x128xf32>
    %47 = tpu.matmul %45, %46, %cst_24 {dimension_numbers = #tpu.dot_dimension_numbers<[1], [0], [0], [1], [0, 0, 1, 1], [], []>} : vector<8x8xbf16>, vector<8x128xbf16>, vector<8x128xf32> -> vector<8x128xf32>
    %48 = vector.broadcast %42 : vector<8x1xf32> to vector<8x128xf32>
    %49 = arith.mulf %48, %47 : vector<8x128xf32>
    %c0_25 = arith.constant 0 : index
    %c0_26 = arith.constant 0 : index
    %50 = vector.load %arg7[%c0_25, %c0_26] : memref<1x128xf32, #tpu.memory_space<vmem>>, vector<1x128xf32>
    %51 = vector.broadcast %50 : vector<1x128xf32> to vector<8x128xf32>
    %52 = arith.addf %49, %51 : vector<8x128xf32>
    %53 = arith.negf %52 : vector<8x128xf32>
    %54 = math.exp %53 : vector<8x128xf32>
    %cst_27 = arith.constant 1.000000e+00 : f32
    %55 = vector.broadcast %cst_27 : f32 to vector<8x128xf32>
    %56 = arith.addf %55, %54 : vector<8x128xf32>
    %57 = arith.divf %55, %56 : vector<8x128xf32>
    %c0_28 = arith.constant 0 : index
    %c0_29 = arith.constant 0 : index
    %c0_30 = arith.constant 0 : index
    %58 = vector.load %arg8[%c0_28, %c0_29, %c0_30] : memref<1x8x128xf32, #tpu.memory_space<vmem>>, vector<1x8x128xf32>
    %59 = vector.shape_cast %58 : vector<1x8x128xf32> to vector<8x128xf32>
    %60 = vector.shape_cast %57 : vector<8x128xf32> to vector<1x8x128xf32>
    tpu.vector_store %arg8[%c0_28, %c0_29, %c0_30], %60 {strides = array<i32>} : memref<1x8x128xf32, #tpu.memory_space<vmem>>, vector<1x8x128xf32>,
    return
  }
  func.func @transform_0(%arg0: i32) -> (i32, i32, i32) {
    %c0_i32 = arith.constant 0 : i32
    %c0_i32_0 = arith.constant 0 : i32
    %c0_i32_1 = arith.constant 0 : i32
    return %arg0, %c0_i32, %c0_i32_0 : i32, i32, i32
  }
  func.func @transform_1(%arg0: i32) -> (i32, i32, i32) {
    %c0_i32 = arith.constant 0 : i32
    %c0_i32_0 = arith.constant 0 : i32
    %c0_i32_1 = arith.constant 0 : i32
    return %arg0, %c0_i32, %c0_i32_0 : i32, i32, i32
  }
  func.func @transform_2(%arg0: i32) -> (i32, i32, i32) {
    %c0_i32 = arith.constant 0 : i32
    %c0_i32_0 = arith.constant 0 : i32
    %c0_i32_1 = arith.constant 0 : i32
    return %arg0, %c0_i32, %c0_i32_0 : i32, i32, i32
  }
  func.func @transform_3(%arg0: i32) -> (i32, i32) {
    %c0_i32 = arith.constant 0 : i32
    %c0_i32_0 = arith.constant 0 : i32
    %c0_i32_1 = arith.constant 0 : i32
    return %c0_i32, %c0_i32_0 : i32, i32
  }
  func.func @transform_4(%arg0: i32) -> (i32, i32) {
    %c0_i32 = arith.constant 0 : i32
    %c0_i32_0 = arith.constant 0 : i32
    %c0_i32_1 = arith.constant 0 : i32
    return %c0_i32, %c0_i32_0 : i32, i32
  }
  func.func @transform_5(%arg0: i32) -> (i32, i32) {
    %c0_i32 = arith.constant 0 : i32
    %c0_i32_0 = arith.constant 0 : i32
    %c0_i32_1 = arith.constant 0 : i32
    return %c0_i32, %c0_i32_0 : i32, i32
  }
  func.func @transform_6(%arg0: i32) -> (i32, i32) {
    %c0_i32 = arith.constant 0 : i32
    %c0_i32_0 = arith.constant 0 : i32
    %c0_i32_1 = arith.constant 0 : i32
    return %c0_i32, %c0_i32_0 : i32, i32
  }
  func.func @transform_7(%arg0: i32) -> (i32, i32, i32) {
    %c0_i32 = arith.constant 0 : i32
    %c0_i32_0 = arith.constant 0 : i32
    %c0_i32_1 = arith.constant 0 : i32
    return %arg0, %c0_i32, %c0_i32_0 : i32, i32, i32
  }
}

</mosaic_0001>

<bundles_post_ra>
// kernel: tpu_custom_call.1
= control target key start
LH: loop header
LB: loop body
LE: loop exit
PB: predicated region body
PF: predicated region fallthrough
CT: control target
= control target key end

     0   :  { %s1443_s0 = inlined_call_operand.vmem [shape: f32[2,8,4], index: 0, kind: input, shape index: {}]   ;;  %s1444_s1 = inlined_call_operand.hbm [shape: f32[2,8,8], index: 1, kind: input, shape index: {}]   ;;  %s1445_s2 = inlined_call_operand.hbm [shape: f32[2,8,32], index: 2, kind: input, shape index: {}]   ;;  %s1446_s3 = inlined_call_operand.hbm [shape: f32[4,32], index: 3, kind: input, shape index: {}]   ;;  %s1447_s4 = inlined_call_operand.vmem [shape: f32[1,32], index: 4, kind: input, shape index: {}]   ;;  %s1448_s5 = inlined_call_operand.vmem [shape: f32[32,128], index: 5, kind: input, shape index: {}]   ;;  %s1449_s6 = inlined_call_operand.vmem [shape: f32[1,128], index: 6, kind: input, shape index: {}]   ;;  %s1450_s7 = inlined_call_operand.hbm [shape: f32[2,8,128], index: 7, kind: output, shape index: {}]  }
   0x1   :  { %1458 = sst [smem:[#allocation16_spill]] %s1446_s3 }
   0x2   :  { %12 = vsyncpa [#allocation3], 0 }
   0x3   :  { %14 = vsyncpa [#allocation3 + $0x1], 0 }
   0x4   :  { %15 = vsyncpa [#allocation6], 0 }
   0x5   :  { %17 = vsyncpa [#allocation6 + $0x1], 0 }
   0x6   :  { %18 = vsyncpa [#allocation4], 0 }
   0x7   :  { %20 = vsyncpa [#allocation4 + $0x1], 0  ;;  %s1186_s24 = smov 0   ;;  %s1188_s25 = smov 0  }
   0x8   :  { %s1190_s26 = smov 0   ;;  %s1192_s27 = smov 0  }
   0x9 LB: > { %1459 = sst [smem:[#allocation13_spill]] %s1134_s26  ;;  %s1207_s28 = sadd.s32 4294967295, %s1138_s27   ;;  %s1138_s27 = sphi %s1192_s27, %s1478_s27   ;;  %s1134_s26 = sphi %s1190_s26, %s1480_s26   ;;  %s1130_s25 = sphi %s1188_s25, %s1482_s25   ;;  %s1126_s24 = sphi %s1186_s24, %s1481_s24  }
   0xa   : > { %s838_s29 = sadd.s32 4294967294, %s1138_s27   ;;  %p72_p0 = scmp.ne.s32.totalorder %s1130_s25, %s1126_s24 }
   0xb   : > { %p1451_p1 = scmp.eq.s32.totalorder %s1207_s28, 0  ;;  %p212_p3 = scmp.eq.s32.totalorder %s838_s29, 1 }
   0xc   : > { %p839_p5 = scmp.ge.s32.totalorder %s1138_s27, 1  ;;  %p219_p7 = scmp.lt.s32.totalorder %s1138_s27, 3 }
   0xd   : > { %p1216_p4 = por %p1451_p1, %p72_p0  ;;  %p1221_p6 = por %p212_p3, %p72_p0 }
   0xe   : > { %p1226_p8 = pnand %p839_p5, %p219_p7  ;;  %s1140_s10 = smov [#allocation7]  }
   0xf   : > { %s1460_s30 = scalar_select %p1216_p4, 1, 0 }
  0x10   : > { %s1461_s8 = scalar_select %p1221_p6, 1, 0 }
  0x11   : > { %s1462_s9 = scalar_select %p1226_p8, 1, 0 }
  0x12   : > { %s232_s11 = sshll.u32 %s1140_s10, 4  ;;  %p922_p10 = pneg %p1226_p8  ;;  %s233_s11 = int_to_ptr.vmem [resolvable:$true] %s232_s11 }
  0x13   : > { %s1234_s12 = sadd.s32 1, %s1138_s27   ;;  %s59_s16 = sadd.s32 1, %s1134_s26 }
  0x14   : > { %1463 = sst [smem:[#allocation14_spill]] %s1234_s12  ;;  %p1238_p11 = pnand %p922_p10, %p1451_p1 }
  0x15   : > { %s56_s14 = ssub.s32 %s1138_s27, %s1234_s12  ;;  %p66_p13 = scmp.ne.s32.totalorder %s1134_s26, %s1130_s25 }
  0x16   : > { %p1244_p12 = scmp.eq.s32.totalorder %s56_s14, 0  ;;  %p986_p0 = pneg %p1238_p11 }
  0x17   : > { %s995_s17 = scalar_lea.vmem %s233_s11, 64  ;;  %p1003_p9 = scmp.lt.s32.totalorder %s233_s11, %s233_s11 }
  0x18   : > { %p996_p3 = scmp.ne.s32.totalorder %s233_s11, %s995_s17  ;;  %p1004_p2 = scmp.lt.s32.totalorder %s995_s17, %s995_s17 }
  0x1a   : > { %p998_p5 = pnand %p996_p3, %p986_p0  ;;  %p1005_p10 = por %p1004_p2, %p1003_p9 }
  0x1c   : > { %p999_p7 = pneg %p998_p5 }
  0x1e   : > { %p1006_p1 = pnand %p1005_p10, %p999_p7 }
  0x20   : > { %1009 = shalt.err (!%p1006_p1)
}
  0x21   : > { %s1466_s3 = sld [smem:[#allocation16_spill]]  ;;  %p67_p1 = scmp.eq.s32.totalorder %s1138_s27, 0 }
  0x22   : > { %s1261_s20 = scalar_select %p1244_p12, %s1134_s26, %s59_s16  }
  0x23   : > { %p1468_p2 = scmp.eq.s32.totalorder %s1207_s28, 1  ;;  %p938_p0 = scmp.lt.s32.totalorder %s1138_s27, 2 }
  0x24   : > { %1467 = sst [smem:[#allocation15_spill]] %s1261_s20  ;;  %s259_s22 = sand.u32 1, %s1134_s26  }
  0x25   : > { %p1269_p9 = por %p1468_p2, %p66_p13  ;;  %p68_p3 = por %p67_p1, %p66_p13 }
  0x26   : > { %s1278_s23 = sshll.u32 %s259_s22, 3  ;;  %s843_s29 = sshll.u32 %s1138_s27, 7 }
  0x27   : > { %925 = dma.hbm_to_vmem [thread:$0]  (!%p1238_p11), %s1466_s3, 64, %s233_s11, [#allocation6]  }
  0x28   : > { %s1469_s21 = scalar_select %p1269_p9, 1, 0 }
  0x29   : > { %s1284_s13 = scalar_lea.hbm %s1444_s1, %s843_s29  ;;  %s263_s14 = scalar_lea.vmem [#allocation2], %s1278_s23 }
  0x2a   : > { %s270_s15 = sshll.u32 %s263_s14, 4  ;;  %p1287_p11 = pnand %p938_p0, %p68_p3  ;;  %s271_s15 = int_to_ptr.vmem [resolvable:$true] %s270_s15 }
  0x2b   : > { %s1294_s19 = scalar_lea.hbm %s1445_s2, %s843_s29  ;;  %s260_s10 = scalar_lea.sflag [#allocation3], %s259_s22 }
  0x2c   : > { %s1010_s11 = scalar_lea.hbm %s1284_s13, 128  ;;  %p1012_p13 = pneg %p1287_p11 }
  0x2d   : > { %p1011_p12 = scmp.ne.s32.totalorder %s1284_s13, %s1010_s11  ;;  %s1015_s20 = scalar_lea.hbm %s1444_s1, 256 }
  0x2e   : > { %p1016_p10 = scmp.lt.s32.totalorder %s1284_s13, %s1444_s1  ;;  %p1017_p1 = scmp.lt.s32.totalorder %s1015_s20, %s1010_s11 }
  0x2f   : > { %p1013_p5 = pnand %p1012_p13, %p1011_p12 }
  0x30   : > { %p1018_p2 = por %p1017_p1, %p1016_p10 }
  0x31   : > { %p1014_p7 = pneg %p1013_p5 }
  0x33   : > { %p1019_p0 = pnand %p1018_p2, %p1014_p7 }
  0x35   : > { %1022 = shalt.err (!%p1019_p0)
}
  0x36   : > { %s1023_s22 = scalar_lea.vmem %s271_s15, 128  ;;  %s1141_s29 = smov [#allocation2]  }
  0x37   : > { %p1024_p3 = scmp.ne.s32.totalorder %s271_s15, %s1023_s22  ;;  %s1028_s17 = sshll.u32 %s1141_s29, 4  ;;  %s1029_s17 = int_to_ptr.vmem [resolvable:$false] %s1028_s17 }
  0x38   : > { %s1030_s3 = scalar_lea.vmem %s1029_s17, 256  ;;  %p1031_p5 = scmp.lt.s32.totalorder %s271_s15, %s1029_s17 }
  0x39   : > { %p1026_p6 = pnand %p1024_p3, %p1012_p13  ;;  %p1032_p9 = scmp.lt.s32.totalorder %s1030_s3, %s1023_s22 }
  0x3b   : > { %p1027_p12 = pneg %p1026_p6  ;;  %p1033_p4 = por %p1032_p9, %p1031_p5 }
  0x3d   : > { %p1034_p8 = pnand %p1033_p4, %p1027_p12 }
  0x3f   : > { %1037 = shalt.err (!%p1034_p8)
}
  0x40   : > { %929 = dma.hbm_to_vmem [thread:$0]  (!%p1287_p11), %s1284_s13, 128, %s271_s15, %s260_s10  }
  0x41   : > { %s277_s26 = sand.u32 1, %s1138_s27   ;;  %s281_s12 = scalar_lea.vmem [#allocation5], %s1278_s23 }
  0x42   : > { %s288_s20 = sshll.u32 %s281_s12, 4  ;;  %s278_s18 = scalar_lea.sflag [#allocation6], %s277_s26  ;;  %s289_s20 = int_to_ptr.vmem [resolvable:$true] %s288_s20 }
  0x43   : > { %s1038_s11 = scalar_lea.hbm %s1294_s19, 128  ;;  %s1043_s29 = scalar_lea.hbm %s1445_s2, 256 }
  0x44   : > { %p1039_p6 = scmp.ne.s32.totalorder %s1294_s19, %s1038_s11  ;;  %p1044_p9 = scmp.lt.s32.totalorder %s1294_s19, %s1445_s2 }
  0x45   : > { %p1045_p7 = scmp.lt.s32.totalorder %s1043_s29, %s1038_s11 }
  0x46   : > { %p1041_p4 = pnand %p1039_p6, %p1012_p13 }
  0x47   : > { %p1046_p10 = por %p1045_p7, %p1044_p9 }
  0x48   : > { %p1042_p8 = pneg %p1041_p4 }
  0x4a   : > { %p1047_p1 = pnand %p1046_p10, %p1042_p8 }
  0x4c   : > { %1050 = shalt.err (!%p1047_p1)
}
  0x4d   : > { %s1051_s23 = scalar_lea.vmem %s289_s20, 128  ;;  %s1142_s13 = smov [#allocation5]  }
  0x4e   : > { %p1052_p2 = scmp.ne.s32.totalorder %s289_s20, %s1051_s23  ;;  %s1056_s15 = sshll.u32 %s1142_s13, 4  ;;  %s1057_s15 = int_to_ptr.vmem [resolvable:$false] %s1056_s15 }
  0x4f   : > { %s1058_s10 = scalar_lea.vmem %s1057_s15, 256  ;;  %p1059_p12 = scmp.lt.s32.totalorder %s289_s20, %s1057_s15 }
  0x50   : > { %p1054_p0 = pnand %p1052_p2, %p1012_p13  ;;  %p1060_p5 = scmp.lt.s32.totalorder %s1058_s10, %s1051_s23 }
  0x52   : > { %p1055_p3 = pneg %p1054_p0  ;;  %p1061_p6 = por %p1060_p5, %p1059_p12 }
  0x54   : > { %p1062_p4 = pnand %p1061_p6, %p1055_p3 }
  0x56   : > { %1065 = shalt.err (!%p1062_p4)
}
  0x57   : > { %932 = dma.hbm_to_vmem [thread:$0]  (!%p1287_p11), %s1294_s19, 128, %s289_s20, %s278_s18  }
  0x58   : > { %p1471_p8 = scmp.ne.s32.totalorder %s1462_s9, 0 }
  0x59   : > { %s1339_s26 = sand.u32 (!%p1471_p8), 1, %s1130_s25   ;;  %p1472_p13 = scmp.ne.s32.totalorder (!%p1471_p8), %s1460_s30, 0 }
  0x5a   : > { %297 = sbr.rel (%p1471_p8) target bundleno = 954 (0x3ba), region = 48  ;;  %s1342_s12 = sshll.u32 (!%p1471_p8), %s1339_s26, 3 }
  0x5b   : > { %s300_s11 = scalar_lea.sflag (!%p1471_p8), [#allocation3], %s1339_s26  ;;  %s303_s14 = scalar_lea.vmem (!%p1471_p8), [#allocation2], %s1342_s12 }
  0x5f   : > { %1109 = dma.done.wait (%p1472_p13), %s300_s11, 128  }
  0x60   : > { %1111 = vsyncadd (%p1472_p13), %s300_s11, 4294967168  ;;  %s308_s9 = sand.u32 1, %s1207_s28   ;;  %s312_s19 = scalar_lea.vmem [#allocation5], %s1342_s12 }
  0x61   : > { %s309_s16 = scalar_lea.sflag [#allocation6], %s308_s9 }
  0x62   : > { %1113 = dma.done.wait (%p1472_p13), %s309_s16, 128  }
  0x63   : > { %1115 = vsyncadd (%p1472_p13), %s309_s16, 4294967168  ;;  %p1473_p11 = scmp.eq.s32.totalorder %s1207_s28, 0 }
  0x65   : > { %1117 = dma.done.wait (%p1473_p11), [#allocation6], 64   ;;  %p1474_p9 = pmov %p1473_p11 }
  0x66   : > { %p356_p7 = scmp.lt.s32.totalorder %s1207_s28, 1  ;;  %v363_v0 = vlaneseq  ;;  %v1143_v1 = vmov 0.0   ;;  %vm1144_vm0 = vmmov 0   ;;  %vm373_vm1 = vcmask 1043456   ;;  %v416_v4 = vld [vmem:[#allocation7] sm:$0xf] }
  0x67   : > { %1119 = vsyncadd (%p1474_p9), [#allocation6], 4294967232  ;;  %884 = vmatprep.subr.mxu1 %v1143_v1  ;;  %886 = vmatprep.mubr.msk.f32.mxu1 %vm1144_vm0, %v1143_v1  ;;  %vm417_vm3 = vcmask 31744   ;;  %vm369_vm4 = vcmask 64512   ;;  %v361_v6 = vld [vmem:[%s303_s14] sm:$0xff]  ;;  %v564_v20 = vld [vmem:[%s1448_s5 + $0x18] sm:$0xff] }
  0x68   : > { %s357_s20 = scalar_select %p356_p7, %s1207_s28, 1  ;;  %v364_v2 = vshrl.u32 %v363_v0, 7  ;;  %v366_v3 = vand.u32 127, %v363_v0  ;;  %878 = vmatprep.subr.bf16.mxu0 %v1143_v1  ;;  %880 = vmatprep.mubr.msk.bf16.mxu0 %vm1144_vm0, %v1143_v1  ;;  %v368_v9 = vpack.c.bf16 %v361_v6, %v361_v6  ;;  %v563_v21 = vld [vmem:[%s1448_s5 + $0x10] sm:$0xff]  ;;  %v562_v22 = vld [vmem:[%s1448_s5 + $0x8] sm:$0xff]  ;;  %v561_v23 = vld [vmem:[%s1448_s5] sm:$0xff] }
  0x69   : > { %885 = vmatpush3.msk.msra.mxu1 %vm373_vm1, %v416_v4  ;;  %v856_v31 = vld [vmem:[%s1447_s4] ss:$0 sm:$0xff]  ;;  %v559_v35 = vld [vmem:[%s312_s19] sm:$0xff]  ;;  %vm565_vm5 = vcmask 261120   ;;  %s355_s18 = scalar_lea.vmem [#allocation8], %s1342_s12  ;;  %s711_s23 = scalar_lea.sflag [#allocation4], %s1339_s26 }
  0x6a   : > { %s851_s30 = sshll.u32 %s357_s20, 3  ;;  %vm367_vm2 = vcmp.eq.s32.totalorder %v364_v2, %v366_v3  ;;  %889 = vmatprep.subr.bf16.mxu1 %v1143_v1  ;;  %v374_v10 = vsel %vm373_vm1, %v368_v9, 0  ;;  %v859_v50 = vld [vmem:[%s1449_s6] ss:$0 sm:$0xff]  ;;  %s724_s22 = sshll.u32 %s355_s18, 4  ;;  %s725_s22 = int_to_ptr.vmem [resolvable:$true] %s724_s22 }
  0x6b   : > { %s359_s29 = scalar_lea.vmem %s1443_s0, %s851_s30  ;;  %v494_v7 = vsel %vm367_vm2, 1.0, %v361_v6  ;;  %879 = vmatpush3.bf16.msra.mxu0 %v374_v10  ;;  %s862_s30 = sshll.u32 %s1207_s28, 7 }
  0x6c   : > { %v362_v5 = vld [vmem:[%s359_s29] sm:$0xff]  ;;  %v495_v8 = vsel %vm369_vm4, %v494_v7, 0.0  ;;  %895 = vmatprep.subr.mxu0 %v1143_v1  ;;  %v501_v18 = vpack.c.bf16 %v494_v7, %v494_v7  ;;  %s1406_s3 = scalar_lea.hbm %s1450_s7, %s862_s30  ;;  %s1066_s13 = scalar_lea.vmem %s725_s22, 128 }
  0x6d   : > { %887 = vmatmul.mubr.msk.f32.vlgmr.msra.gmra.mxu1 %vm417_vm3, %v362_v5  ;;  %496 = vadd.xlane.f32.xlu0 %v495_v8  ;;  %p1067_p10 = scmp.ne.s32.totalorder %s725_s22, %s1066_s13  ;;  %p1475_p1 = scmp.ne.s32.totalorder %s1469_s21, 0 }
  0x6e   : > { %891 = vmatprep.mubr.msk.bf16.mxu1 %vm1144_vm0, %v1143_v1  ;;  %881 = vmatmul.mubr.msk.bf16.vlgmr.msra.gmra.mxu0 %vm369_vm4, %v368_v9  ;;  %s1145_s15 = smov [#allocation8]  }
  0x6f   : > { %903 = vmatprep.mubr.msk.f32.mxu0 %vm1144_vm0, %v1143_v1  ;;  %896 = vmatpush3.msra.mxu0 %v564_v20  ;;  %p1068_p2 = pnand %p1067_p10, %p1475_p1  ;;  %s1070_s10 = sshll.u32 %s1145_s15, 4  ;;  %s1071_s10 = int_to_ptr.vmem [resolvable:$false] %s1070_s10 }
  0x70   : > { %897 = vmatprep.subr.mxu0 %v1143_v1  ;;  %s1072_s28 = scalar_lea.vmem %s1071_s10, 256  ;;  %p1073_p3 = scmp.lt.s32.totalorder %s725_s22, %s1071_s10 }
  0x71   : > { %898 = vmatpush3.msra.mxu0 %v563_v21  ;;  %p1069_p0 = pneg %p1068_p2  ;;  %p1074_p12 = scmp.lt.s32.totalorder %s1072_s28, %s1066_s13 }
  0x72   : > { %899 = vmatprep.subr.mxu0 %v1143_v1 }
  0x73   : > { %900 = vmatpush3.msra.mxu0 %v562_v22  ;;  %p1075_p5 = por %p1074_p12, %p1073_p3 }
  0x74   : > { %901 = vmatprep.subr.mxu0 %v1143_v1 }
  0x75   : > { %902 = vmatpush3.msra.mxu0 %v561_v23  ;;  %p1076_p6 = pnand %p1075_p5, %p1069_p0 }
  0xf6   : > { %v497_v11 = vpop.xlane.xlu0 %496 }
  0xf7   : > { %v498_v12 = vmax.f32 %v497_v11, 1.0 }
  0xf9   : > { %976 = vrsqrt.f32 %v498_v12 }
 0x106   : > { %v977_v13 = vpop.eup %976 }
 0x12d   : > { %v490_v14 = vpop.f32.mrf.mxu1 }
 0x12e   : > { %v500_v15 = vmul.f32 %v977_v13, %v490_v14  ;;  %v410_v24 = vpop.f32.mrf.mxu0 }
 0x12f   : > { %v888_v16 = vpop.f32.mrf.mxu1  ;;  %v639_v25 = vsel %vm367_vm2, 1.0, %v410_v24 }
 0x130   : > { %v502_v17 = vpack.c.bf16 %v500_v15, %v500_v15  ;;  %v882_v26 = vpop.f32.mrf.mxu0  ;;  %v640_v27 = vsel %vm369_vm4, %v639_v25, 0.0  ;;  %v646_v48 = vpack.c.bf16 %v639_v25, %v639_v25 }
 0x131   : > { %641 = vadd.xlane.f32.xlu0 %v640_v27 }
 0x132   : > { %v507_v19 = vsel %vm373_vm1, %v502_v17, 0  ;;  %v413_v28 = vpop.f32.mrf.mxu0 }
 0x133   : > { %890 = vmatpush3.bf16.msra.mxu1 %v507_v19 }
 0x134   : > { %906 = vmatprep.subr.bf16.mxu1 %v1143_v1  ;;  %v883_v29 = vpop.f32.mrf.mxu0 }
 0x136   : > { %892 = vmatmul.mubr.msk.bf16.vlgmr.msra.gmra.mxu1 %vm369_vm4, %v501_v18 }
 0x137   : > { %908 = vmatprep.mubr.msk.bf16.mxu1 %vm1144_vm0, %v1143_v1 }
 0x1ba   : > { %v642_v40 = vpop.xlane.xlu0 %641 }
 0x1bb   : > { %v643_v41 = vmax.f32 %v642_v40, 1.0 }
 0x1bd   : > { %978 = vrsqrt.f32 %v643_v41 }
 0x1ca   : > { %v979_v42 = vpop.eup %978 }
 0x1f6   : > { %v543_v30 = vpop.f32.mrf.mxu1 }
 0x1f7   : > { %v549_v32 = vmul.f32 %v977_v13, %v543_v30 }
 0x1f8   : > { %v893_v33 = vpop.f32.mrf.mxu1 }
 0x1f9   : > { %v557_v34 = vadd.f32 %v856_v31, %v549_v32 }
 0x1fa   : > { %v546_v36 = vpop.f32.mrf.mxu1 }
 0x1fb   : > { %v558_v37 = vmax.f32 %v557_v34, 0.0 }
 0x1fc   : > { %v894_v38 = vpop.f32.mrf.mxu1 }
 0x1fd   : > { %v560_v39 = vmul.f32 %v559_v35, %v558_v37 }
 0x1ff   : > { %904 = vmatmul.mubr.msk.f32.vlgmr.msra.gmra.mxu0 %vm565_vm5, %v560_v39 }
 0x2bf   : > { %v635_v43 = vpop.f32.mrf.mxu0 }
 0x2c0   : > { %v645_v44 = vmul.f32 %v979_v42, %v635_v43 }
 0x2c1   : > { %v905_v45 = vpop.f32.mrf.mxu0 }
 0x2c2   : > { %v647_v46 = vpack.c.bf16 %v645_v44, %v645_v44 }
 0x2c4   : > { %v652_v47 = vsel %vm373_vm1, %v647_v46, 0 }
 0x2c5   : > { %907 = vmatpush3.bf16.msra.mxu1 %v652_v47 }
 0x2c8   : > { %909 = vmatmul.mubr.msk.bf16.vlgmr.msra.gmra.mxu1 %vm369_vm4, %v646_v48 }
 0x388   : > { %v688_v49 = vpop.f32.mrf.mxu1 }
 0x389   : > { %v694_v51 = vmul.f32 %v979_v42, %v688_v49 }
 0x38a   : > { %v910_v52 = vpop.f32.mrf.mxu1 }
 0x38b   : > { %v702_v53 = vadd.f32 %v859_v50, %v694_v51 }
 0x38c   : > { %v691_v54 = vpop.f32.mrf.mxu1 }
 0x38d   : > { %v860_v55 = vmul.f32 -1.442695, %v702_v53 }
 0x38e   : > { %v911_v56 = vpop.f32.mrf.mxu1 }
 0x38f   : > { %980 = vpow2.f32 %v860_v55 }
 0x39c   : > { %v981_v57 = vpop.eup %980 }
 0x39d   : > { %v706_v58 = vadd.f32 1.0, %v981_v57 }
 0x39f   : > { %982 = vrcp.f32 %v706_v58 }
 0x3ac   : > { %v983_v59 = vpop.eup %982 }
 0x3ad   : > { %709 = vst [vmem:[%s355_s18] sm:$0xff] %v983_v59 }
 0x3ae   : > { %1079 = shalt.err (!%p1076_p6)
}
 0x3af   : > { %s1080_s12 = scalar_lea.hbm %s1406_s3, 128  ;;  %s1084_s14 = scalar_lea.hbm %s1450_s7, 256 }
 0x3b0   : > { %p1081_p4 = scmp.ne.s32.totalorder %s1406_s3, %s1080_s12  ;;  %p1085_p11 = scmp.lt.s32.totalorder %s1406_s3, %s1450_s7 }
 0x3b1   : > { %p1086_p9 = scmp.lt.s32.totalorder %s1084_s14, %s1080_s12 }
 0x3b2   : > { %p1082_p8 = pnand %p1081_p4, %p1475_p1 }
 0x3b3   : > { %p1087_p7 = por %p1086_p9, %p1085_p11 }
 0x3b4   : > { %p1083_p13 = pneg %p1082_p8 }
 0x3b6   : > { %p1088_p10 = pnand %p1087_p7, %p1083_p13 }
 0x3b8   : > { %1091 = shalt.err (!%p1088_p10)
}
 0x3b9   : > { %920 = dma.vmem_to_hbm [thread:$0]  (%p1475_p1), %s725_s22, 128, %s1406_s3, %s711_s23  }
 0x3ba PF: > { %s736_s19 = sand.u32 1, %s1126_s24   ;;  %p1476_p2 = scmp.ne.s32.totalorder %s1461_s8, 0 }
 0x3bb   : > { %p1477_p0 = scmp.ge.s32.totalorder %s1138_s27, 2  ;;  %s737_s20 = scalar_lea.sflag [#allocation4], %s736_s19 }
 0x3bd   : > { %p934_p3 = pnand %p1477_p0, %p1476_p2 }
 0x3bf   : > { %p935_p12 = pneg %p934_p3 }
 0x3c1   : > { %1121 = dma.done.wait (%p935_p12), %s737_s20, 128  }
 0x3c2   : > { %1123 = vsyncadd (%p935_p12), %s737_s20, 4294967168  ;;  %s1478_s27 = sld [smem:[#allocation14_spill]]  ;;  %s1481_s24 = smov %s1130_s25 }
 0x3c3   : > { %s1479_s30 = sld [smem:[#allocation13_spill]] }
 0x3c4   : > { %s1480_s26 = sld [smem:[#allocation15_spill]] }
 0x3c8   : > { %p23_p5 = scmp.ge.s32.totalorder %s1478_s27, 4  }
 0x3c9   : > { %s1482_s25 = smov %s1479_s30 }
 0x3ca   :  { %25 = sbr.rel (!%p23_p5) target bundleno = 9 (0x9), region = 113 }
 0x3cf   :  { %742 = vsyncpa [#allocation3], 1 }
 0x3d0   :  { %744 = vsyncpa [#allocation3 + $0x1], 1 }
 0x3d1   :  { %745 = vsyncpa [#allocation6], 1 }
 0x3d2   :  { %747 = vsyncpa [#allocation6 + $0x1], 1 }
 0x3d3   :  { %748 = vsyncpa [#allocation4], 1 }
 0x3d4   :  { %750 = vsyncpa [#allocation4 + $0x1], 1 }

</bundles_post_ra>
